<compile_context>
chip_gen: v5e
topology: v5e:2x2
jax: 0.10.0
libtpu: 0.0.40
codegen_flags: <defaults>
</compile_context>

<pallas_src>
import functools

import jax
import jax.numpy as jnp
from jax.experimental import pallas as pl
from jax.experimental.pallas import tpu as pltpu

IN_F = 16      # per-map input features
HID = 64       # per-map hidden width
OUT_F = 6      # per-map real outputs (2x3 affine)
OUT_PAD = 32   # per-map padded output width (num_maps=4 -> 128 total lanes)
MAX_TB = 1024  # row tile cap (works within scoped VMEM on v5e/v6e/v7x)


# ----------------------------- Pallas kernel ------------------------------- #

def _decoder_kernel(x_ref, w1_ref, b1_ref, w2_ref, b2_ref, o_ref):
    x = x_ref[...].astype(jnp.bfloat16)                                # (TB, M*16)
    h = jnp.dot(x, w1_ref[...], preferred_element_type=jnp.float32)    # MXU, f32 acc
    h = jnp.maximum(h + b1_ref[...], 0.0)                              # bias + ReLU (f32)
    o = jnp.dot(h.astype(jnp.bfloat16), w2_ref[...],
                preferred_element_type=jnp.float32) + b2_ref[...]      # (TB, M*32) f32
    o_ref[...] = o.astype(jnp.bfloat16)


# ------------------------------- JAX glue ---------------------------------- #

def _block_diag(blocks):
    """Block-diagonal matrix from same-shaped blocks."""
    n = len(blocks)
    r, c = blocks[0].shape
    out = jnp.zeros((n * r, n * c), blocks[0].dtype)
    for i, blk in enumerate(blocks):
        out = out.at[i * r:(i + 1) * r, i * c:(i + 1) * c].set(blk)
    return out


def prepare_params(per_map, translate_only=False):
    """per_map: list of (w1 (64,16), b1 (64,), w2 (6,64), b2 (6,)) in PyTorch layout.
    Returns pre-transposed / padded / block-diagonal weights (done ONCE, outside jit).
    translate_only is folded into W2/b2: zeroed columns + exact 1/0 bias entries
    for the overwritten affine entries [0,0]=1, [0,1]=0, [1,0]=0, [1,1]=1."""
    force_idx = jnp.array([0, 1, 3, 4])
    force_val = jnp.array([1.0, 0.0, 0.0, 1.0], jnp.float32)
    w1_blocks, w2_blocks, b1_parts, b2_parts = [], [], [], []
    for w1, b1, w2, b2 in per_map:
        w2p = jnp.zeros((HID, OUT_PAD), jnp.float32).at[:, :OUT_F].set(w2.T)
        b2p = jnp.zeros((OUT_PAD,), jnp.float32).at[:OUT_F].set(b2)
        if translate_only:
            w2p = w2p.at[:, force_idx].set(0.0)
            b2p = b2p.at[force_idx].set(force_val)
        w1_blocks.append(w1.T)                                         # (16, 64)
        w2_blocks.append(w2p)                                          # (64, 32)
        b1_parts.append(b1)
        b2_parts.append(b2p)
    w1_bd = _block_diag(w1_blocks).astype(jnp.bfloat16)   # (M*16, M*64)
    w2_bd = _block_diag(w2_blocks).astype(jnp.bfloat16)   # (M*64, M*32)
    b1 = jnp.concatenate(b1_parts).reshape(1, -1)         # (1, M*64) f32
    b2 = jnp.concatenate(b2_parts).reshape(1, -1)         # (1, M*32) f32
    return (w1_bd, b1, w2_bd, b2)


@functools.partial(jax.jit, static_argnums=(2,))
def transform_decoder_forward(x, params, num_maps):
    w1_bd, b1, w2_bd, b2 = params
    x = x.reshape(-1, num_maps * IN_F)                    # view(-1, num_maps, 16) flattened
    B = x.shape[0]
    K1, K2, NO = num_maps * IN_F, num_maps * HID, num_maps * OUT_PAD

    TB = min(MAX_TB, ((B + 7) // 8) * 8)                  # row tile (multiple of 8)
    grid = (pl.cdiv(B, TB),)

    out = pl.pallas_call(
        _decoder_kernel,
        grid=grid,
        in_specs=[
            pl.BlockSpec((TB, K1), lambda i: (i, 0)),     # x: tiled over rows
            pl.BlockSpec((K1, K2), lambda i: (0, 0)),     # weights/biases: resident
            pl.BlockSpec((1, K2), lambda i: (0, 0)),
            pl.BlockSpec((K2, NO), lambda i: (0, 0)),
            pl.BlockSpec((1, NO), lambda i: (0, 0)),
        ],
        out_specs=pl.BlockSpec((TB, NO), lambda i: (i, 0)),
        out_shape=jax.ShapeDtypeStruct((B, NO), jnp.bfloat16),
        compiler_params=pltpu.CompilerParams(dimension_semantics=("parallel",)),
    )(x, w1_bd, b1, w2_bd, b2)

    # Single fused XLA pass: strip the per-map lane padding, cast back to f32.
    out = out.reshape(B, num_maps, OUT_PAD)[:, :, :OUT_F].astype(jnp.float32)
    return out.reshape(B, num_maps, 2, 3)


# --------------------------- deterministic params --------------------------- #

def init_params(key, num_maps):
    per_map = []
    for _ in range(num_maps):
        key, k1, k2, k3, k4 = jax.random.split(key, 5)
        w1 = jax.random.normal(k1, (HID, IN_F), jnp.float32) / jnp.sqrt(float(IN_F))
        b1 = 0.1 * jax.random.normal(k2, (HID,), jnp.float32)
        w2 = jax.random.normal(k3, (OUT_F, HID), jnp.float32) / jnp.sqrt(float(HID))
        b2 = 0.1 * jax.random.normal(k4, (OUT_F,), jnp.float32)
        per_map.append((w1, b1, w2, b2))
    return per_map


def reference_forward(x, per_map, num_maps, translate_only):
    """Pure-JAX f32 reference matching the PyTorch forward."""
    x = x.reshape(-1, num_maps, IN_F)
    outs = []
    for i, (w1, b1, w2, b2) in enumerate(per_map):
        h = jnp.maximum(x[:, i] @ w1.T + b1, 0.0)
        outs.append((h @ w2.T + b2).reshape(-1, 2, 3))
    out = jnp.stack(outs, axis=1)
    if translate_only:
        out = out.at[:, :, 0, 0].set(1.0)
        out = out.at[:, :, 0, 1].set(0.0)
        out = out.at[:, :, 1, 0].set(0.0)
        out = out.at[:, :, 1, 1].set(1.0)
    return out


# ---------------------------------- main ------------------------------------ #

if __name__ == "__main__":
    num_maps = 4
    key = jax.random.PRNGKey(0)
    kx, kx2, kp = jax.random.split(key, 3)
    per_map = init_params(kp, num_maps)

    # Small primary test (B=2) plus a ragged batch (B=37) to exercise the
    # partial last row-block (padded reads / masked writes).
    for B, kxi in ((2, kx), (37, kx2)):
        x = jax.random.normal(kxi, (B, num_maps, 16), jnp.float32)
        for translate_only in (False, True):
            params = prepare_params(per_map, translate_only)
            out = transform_decoder_forward(x, params, num_maps)
            out = jax.block_until_ready(out)
            assert out.shape == (B, num_maps, 2, 3), out.shape
            assert bool(jnp.all(jnp.isfinite(out)))
            ref = reference_forward(x, per_map, num_maps, translate_only)
            assert bool(jnp.allclose(out, ref, atol=0.1, rtol=0.1)), \
                float(jnp.max(jnp.abs(out - ref)))
            if translate_only:
                # translate_only overwrites must be exact
                assert bool(jnp.all(out[:, :, 0, 0] == 1.0))
                assert bool(jnp.all(out[:, :, 1, 1] == 1.0))
                assert bool(jnp.all(out[:, :, 0, 1] == 0.0))
                assert bool(jnp.all(out[:, :, 1, 0] == 0.0))

    print("KERNEL_OK")
</pallas_src>

<mosaic_0001>
module attributes {stable_mosaic.version = 11 : i64} {
  func.func @_decoder_kernel(%arg0: i32, %arg1: memref<8x64xf32, #tpu.memory_space<vmem>>, %arg2: memref<64x256xbf16, #tpu.memory_space<vmem>>, %arg3: memref<1x256xf32, #tpu.memory_space<vmem>>, %arg4: memref<256x128xbf16, #tpu.memory_space<vmem>>, %arg5: memref<1x128xf32, #tpu.memory_space<vmem>>, %arg6: memref<8x128xbf16, #tpu.memory_space<vmem>>) attributes {dimension_semantics = [#tpu.dimension_semantics<parallel>], iteration_bounds = array<i64: 1>, scalar_prefetch = 0 : i64, scratch_operands = 0 : i64, tpu.core_type = #tpu.core_type<tc>, window_params = [{transform_indices = @transform_0, window_bounds = array<i64: 8, 64>}, {pipeline_mode = #tpu.pipeline_mode<synchronous>, transform_indices = @transform_1, window_bounds = array<i64: 64, 256>}, {pipeline_mode = #tpu.pipeline_mode<synchronous>, transform_indices = @transform_2, window_bounds = array<i64: 1, 256>}, {pipeline_mode = #tpu.pipeline_mode<synchronous>, transform_indices = @transform_3, window_bounds = array<i64: 256, 128>}, {pipeline_mode = #tpu.pipeline_mode<synchronous>, transform_indices = @transform_4, window_bounds = array<i64: 1, 128>}, {transform_indices = @transform_5, window_bounds = array<i64: 8, 128>}]} {
    %c0 = arith.constant 0 : index
    %c0_0 = arith.constant 0 : index
    %0 = vector.load %arg1[%c0, %c0_0] : memref<8x64xf32, #tpu.memory_space<vmem>>, vector<8x64xf32>
    %1 = arith.truncf %0 : vector<8x64xf32> to vector<8x64xbf16>
    %c0_1 = arith.constant 0 : index
    %c0_2 = arith.constant 0 : index
    %2 = vector.load %arg2[%c0_1, %c0_2] : memref<64x256xbf16, #tpu.memory_space<vmem>>, vector<64x256xbf16>
    %cst = arith.constant dense<0.000000e+00> : vector<8x256xf32>
    %3 = tpu.matmul %1, %2, %cst {dimension_numbers = #tpu.dot_dimension_numbers<[1], [0], [0], [1], [0, 0, 1, 1], [], []>} : vector<8x64xbf16>, vector<64x256xbf16>, vector<8x256xf32> -> vector<8x256xf32>
    %c0_3 = arith.constant 0 : index
    %c0_4 = arith.constant 0 : index
    %4 = vector.load %arg3[%c0_3, %c0_4] : memref<1x256xf32, #tpu.memory_space<vmem>>, vector<1x256xf32>
    %5 = vector.broadcast %4 : vector<1x256xf32> to vector<8x256xf32>
    %6 = arith.addf %3, %5 : vector<8x256xf32>
    %cst_5 = arith.constant 0.000000e+00 : f32
    %7 = vector.broadcast %cst_5 : f32 to vector<8x256xf32>
    %8 = arith.maximumf %6, %7 : vector<8x256xf32>
    %9 = arith.truncf %8 : vector<8x256xf32> to vector<8x256xbf16>
    %c0_6 = arith.constant 0 : index
    %c0_7 = arith.constant 0 : index
    %10 = vector.load %arg4[%c0_6, %c0_7] : memref<256x128xbf16, #tpu.memory_space<vmem>>, vector<256x128xbf16>
    %cst_8 = arith.constant dense<0.000000e+00> : vector<8x128xf32>
    %11 = tpu.matmul %9, %10, %cst_8 {dimension_numbers = #tpu.dot_dimension_numbers<[1], [0], [0], [1], [0, 0, 1, 1], [], []>} : vector<8x256xbf16>, vector<256x128xbf16>, vector<8x128xf32> -> vector<8x128xf32>
    %c0_9 = arith.constant 0 : index
    %c0_10 = arith.constant 0 : index
    %12 = vector.load %arg5[%c0_9, %c0_10] : memref<1x128xf32, #tpu.memory_space<vmem>>, vector<1x128xf32>
    %13 = vector.broadcast %12 : vector<1x128xf32> to vector<8x128xf32>
    %14 = arith.addf %11, %13 : vector<8x128xf32>
    %15 = arith.truncf %14 : vector<8x128xf32> to vector<8x128xbf16>
    %c0_11 = arith.constant 0 : index
    %c0_12 = arith.constant 0 : index
    %16 = vector.load %arg6[%c0_11, %c0_12] : memref<8x128xbf16, #tpu.memory_space<vmem>>, vector<8x128xbf16>
    tpu.vector_store %arg6[%c0_11, %c0_12], %15 {strides = array<i32>} : memref<8x128xbf16, #tpu.memory_space<vmem>>, vector<8x128xbf16>,
    return
  }
  func.func @transform_0(%arg0: i32) -> (i32, i32) {
    %c0_i32 = arith.constant 0 : i32
    %c0_i32_0 = arith.constant 0 : i32
    return %arg0, %c0_i32 : i32, i32
  }
  func.func @transform_1(%arg0: i32) -> (i32, i32) {
    %c0_i32 = arith.constant 0 : i32
    %c0_i32_0 = arith.constant 0 : i32
    %c0_i32_1 = arith.constant 0 : i32
    return %c0_i32, %c0_i32_0 : i32, i32
  }
  func.func @transform_2(%arg0: i32) -> (i32, i32) {
    %c0_i32 = arith.constant 0 : i32
    %c0_i32_0 = arith.constant 0 : i32
    %c0_i32_1 = arith.constant 0 : i32
    return %c0_i32, %c0_i32_0 : i32, i32
  }
  func.func @transform_3(%arg0: i32) -> (i32, i32) {
    %c0_i32 = arith.constant 0 : i32
    %c0_i32_0 = arith.constant 0 : i32
    %c0_i32_1 = arith.constant 0 : i32
    return %c0_i32, %c0_i32_0 : i32, i32
  }
  func.func @transform_4(%arg0: i32) -> (i32, i32) {
    %c0_i32 = arith.constant 0 : i32
    %c0_i32_0 = arith.constant 0 : i32
    %c0_i32_1 = arith.constant 0 : i32
    return %c0_i32, %c0_i32_0 : i32, i32
  }
  func.func @transform_5(%arg0: i32) -> (i32, i32) {
    %c0_i32 = arith.constant 0 : i32
    %c0_i32_0 = arith.constant 0 : i32
    return %arg0, %c0_i32 : i32, i32
  }
}

</mosaic_0001>

<bundles_post_ra>
// kernel: transform_decoder_forward.1
= control target key start
LH: loop header
LB: loop body
LE: loop exit
PB: predicated region body
PF: predicated region fallthrough
CT: control target
= control target key end

     0   :  { %10 = vsyncpa [#allocation3], 0  ;;  %s606_s0 = inlined_call_operand.vmem [shape: f32[2,64], index: 0, kind: input, shape index: {}]   ;;  %s607_s1 = inlined_call_operand.hbm [shape: bf16[64,256], index: 1, kind: input, shape index: {}]   ;;  %s608_s2 = inlined_call_operand.vmem [shape: f32[1,256], index: 2, kind: input, shape index: {}]   ;;  %s609_s3 = inlined_call_operand.hbm [shape: bf16[256,128], index: 3, kind: input, shape index: {}]   ;;  %s610_s4 = inlined_call_operand.vmem [shape: f32[1,128], index: 4, kind: input, shape index: {}]   ;;  %s611_s5 = inlined_call_operand.vmem [shape: bf16[2,128], index: 5, kind: output, shape index: {}]  }
   0x1   :  { %s18_s20 = sshll.u32 %s607_s1, 4  ;;  %s19_s20 = int_to_ptr.hbm [resolvable:$true] %s18_s20 }
   0x2   :  { %11 = vsyncpa [#allocation5], 0  ;;  %s552_s21 = smov [#allocation2]   ;;  %s33_s25 = sshll.u32 %s609_s3, 4  ;;  %s34_s25 = int_to_ptr.hbm [resolvable:$true] %s33_s25 }
   0x3   :  { %s20_s22 = sshll.u32 %s552_s21, 4  ;;  %s553_s26 = smov 128   ;;  %s21_s22 = int_to_ptr.vmem [resolvable:$true] %s20_s22 }
   0x4   :  { %s554_s27 = smov 8   ;;  %s555_s28 = smov [#allocation4]  }
   0x5   :  { %26 = dma.hbm_to_vmem [thread:$0]  %s19_s20, 1024, %s21_s22, [#allocation3], %s553_s26, %s553_s26, %s554_s27  }
   0x6   :  { %s35_s29 = sshll.u32 %s555_s28, 4  ;;  %s556_s30 = smov 64   ;;  %s36_s29 = int_to_ptr.vmem [resolvable:$true] %s35_s29 }
   0x7   :  { %s557_s6 = smov 4  }
   0x8   :  { %41 = dma.hbm_to_vmem [thread:$0]  %s34_s25, 2048, %s36_s29, [#allocation5], %s556_s30, %s556_s30, %s557_s6  }
   0x9   :  { %548 = dma.done.wait [#allocation3], 1024  }
   0xa   :  { %549 = vsyncadd [#allocation3], 4294966272 }
   0xb   :  { %550 = dma.done.wait [#allocation5], 2048  }
   0xc   :  { %551 = vsyncadd [#allocation5], 4294965248  ;;  %v397_v0 = vld [vmem:[#allocation2 + $0x30] sm:$0xf]  ;;  %v476_v1 = vld [vmem:[#allocation2 + $0x34] sm:$0xf0] }
   0xd   :  { %v475_v2 = vld [vmem:[#allocation2 + $0x34] sm:$0xf]  ;;  %v398_v3 = vor.u32 %v476_v1, %v397_v0  ;;  %v399_v4 = vld [vmem:[#allocation2 + $0x38] sm:$0xf0]  ;;  %v389_v5 = vld [vmem:[#allocation2 + $0x20] sm:$0xf] }
   0xe   :  { %v474_v6 = vld [vmem:[#allocation2 + $0x24] sm:$0xf0]  ;;  %v402_v7 = vor.u32 %v475_v2, %v399_v4  ;;  %v473_v8 = vld [vmem:[#allocation2 + $0x24] sm:$0xf]  ;;  %v391_v9 = vld [vmem:[#allocation2 + $0x28] sm:$0xf0] }
   0xf   :  { %117 = vmatpush.bf16.msra.mxu0 %v398_v3  ;;  %v390_v10 = vor.u32 %v474_v6, %v389_v5  ;;  %v394_v11 = vor.u32 %v473_v8, %v391_v9  ;;  %v381_v12 = vld [vmem:[#allocation2 + $0x10] sm:$0xf]  ;;  %v472_v13 = vld [vmem:[#allocation2 + $0x14] sm:$0xf0]  ;;  %v471_v14 = vld [vmem:[#allocation2 + $0x14] sm:$0xf] }
  0x10   :  { %130 = vmatpush.bf16.msra.mxu1 %v402_v7  ;;  %v383_v15 = vld [vmem:[#allocation2 + $0x18] sm:$0xf0]  ;;  %v382_v18 = vor.u32 %v472_v13, %v381_v12  ;;  %v483_v19 = vld [vmem:[#allocation4 + $0x30] sm:$0xff]  ;;  %v373_v21 = vld [vmem:[#allocation2] sm:$0xf]  ;;  %vm109_vm0 = vcmask 523264  }
  0x11   :  { %v484_v16 = vld [vmem:[#allocation4 + $0x38] sm:$0xff]  ;;  %v386_v20 = vor.u32 %v471_v14, %v383_v15  ;;  %v470_v22 = vld [vmem:[#allocation2 + $0x4] sm:$0xf0]  ;;  %v491_v23 = vld [vmem:[#allocation4 + $0x70] sm:$0xff]  ;;  %vm304_vm1 = vcmask 1040384  }
  0x12   :  { %v492_v17 = vld [vmem:[#allocation4 + $0x78] sm:$0xff]  ;;  %275 = vmatpush.bf16.msra.mxu2 %v484_v16  ;;  %v469_v24 = vld [vmem:[#allocation2 + $0x4] sm:$0xf]  ;;  %v375_v25 = vld [vmem:[#allocation2 + $0x8] sm:$0xf0]  ;;  %v374_v26 = vor.u32 %v470_v22, %v373_v21 }
  0x13   :  { %118 = vmatpush.bf16.msra.mxu0 %v390_v10  ;;  %288 = vmatpush.bf16.msra.mxu3 %v492_v17  ;;  %v53_v27 = vld [vmem:[%s606_s0] sm:$0xff]  ;;  %v482_v28 = vld [vmem:[#allocation4 + $0x28] sm:$0xff]  ;;  %v378_v29 = vor.u32 %v469_v24, %v375_v25  ;;  %v480_v34 = vld [vmem:[#allocation4 + $0x18] sm:$0xff] }
  0x14   :  { %131 = vmatpush.bf16.msra.mxu1 %v394_v11  ;;  %v490_v30 = vld [vmem:[#allocation4 + $0x68] sm:$0xff]  ;;  %v54_v31 = vpack.c.bf16 %v53_v27, %v53_v27  ;;  %v481_v32 = vld [vmem:[#allocation4 + $0x20] sm:$0xff]  ;;  %v488_v35 = vld [vmem:[#allocation4 + $0x58] sm:$0xff] }
  0x15   :  { %v489_v33 = vld [vmem:[#allocation4 + $0x60] sm:$0xff]  ;;  %v479_v36 = vld [vmem:[#allocation4 + $0x10] sm:$0xff]  ;;  %v478_v38 = vld [vmem:[#allocation4 + $0x8] sm:$0xff] }
  0x16   :  { %276 = vmatpush.bf16.msra.mxu2 %v483_v19  ;;  %v487_v37 = vld [vmem:[#allocation4 + $0x50] sm:$0xff]  ;;  %v486_v39 = vld [vmem:[#allocation4 + $0x48] sm:$0xff]  ;;  %v477_v40 = vld [vmem:[#allocation4] sm:$0xff] }
  0x17   :  { %119 = vmatpush.bf16.msra.mxu0 %v382_v18  ;;  %289 = vmatpush.bf16.msra.mxu3 %v491_v23  ;;  %v485_v41 = vld [vmem:[#allocation4 + $0x40] sm:$0xff] }
  0x18   :  { %132 = vmatpush.bf16.msra.mxu1 %v386_v20  ;;  %v63_v42 = vld [vmem:[%s608_s2] sm:$0x3] }
  0x19   :  { %v65_v43 = vperm.slane %v63_v42, 0  ;;  %v66_v44 = vperm.slane %v63_v42, 1  ;;  %v499_v55 = vld [vmem:[%s610_s4] ss:$0 sm:$0xff] }
  0x1a   :  { %277 = vmatpush.bf16.msra.mxu2 %v482_v28 }
  0x1b   :  { %120 = vmatpush.bf16.msra.mxu0 %v374_v26  ;;  %290 = vmatpush.bf16.msra.mxu3 %v490_v30 }
  0x1c   :  { %133 = vmatpush.bf16.msra.mxu1 %v378_v29 }
  0x1e   :  { %403 = vmatmul.msk.bf16.vlgmr.msra.gmra.mxu0 %vm109_vm0, %v54_v31  ;;  %278 = vmatpush.bf16.msra.mxu2 %v481_v32 }
  0x1f   :  { %404 = vmatmul.msk.bf16.vlgmr.msra.gmra.mxu1 %vm109_vm0, %v54_v31  ;;  %291 = vmatpush.bf16.msra.mxu3 %v489_v33 }
  0x22   :  { %279 = vmatpush.bf16.msra.mxu2 %v480_v34 }
  0x23   :  { %292 = vmatpush.bf16.msra.mxu3 %v488_v35 }
  0x26   :  { %280 = vmatpush.bf16.msra.mxu2 %v479_v36 }
  0x27   :  { %293 = vmatpush.bf16.msra.mxu3 %v487_v37 }
  0x2a   :  { %281 = vmatpush.bf16.msra.mxu2 %v478_v38 }
  0x2b   :  { %294 = vmatpush.bf16.msra.mxu3 %v486_v39 }
  0x2e   :  { %282 = vmatpush.bf16.msra.mxu2 %v477_v40 }
  0x2f   :  { %295 = vmatpush.bf16.msra.mxu3 %v485_v41 }
  0x9b   :  { %v122_v45 = vpop.f32.mrf.mxu0 }
  0x9c   :  { %v123_v46 = vadd.f32 %v122_v45, %v65_v43  ;;  %v135_v47 = vpop.f32.mrf.mxu1 }
  0x9d   :  { %v136_v48 = vadd.f32 %v135_v47, %v66_v44 }
  0x9e   :  { %v139_v49 = vmax.f32 %v123_v46, 0.0 }
  0x9f   :  { %v140_v50 = vmax.f32 %v136_v48, 0.0 }
  0xa0   :  { %v141_v51 = vpack.c.bf16 %v139_v49, %v139_v49 }
  0xa1   :  { %v142_v52 = vpack.c.bf16 %v140_v50, %v140_v50 }
  0xa2   :  { %283 = vmatmul.bf16.vlgmr.msra.gmra.mxu2 %v141_v51 }
  0xa3   :  { %296 = vmatmul.bf16.vlgmr.msra.gmra.mxu3 %v142_v52  ;;  %v124_v53 = vpop.f32.mrf.mxu0 }
  0xa4   :  { %v137_v54 = vpop.f32.mrf.mxu1 }
 0x125   :  { %v284_v56 = vpop.f32.mrf.mxu2 }
 0x126   :  { %v285_v57 = vadd.f32 %v499_v55, %v284_v56  ;;  %v297_v58 = vpop.f32.mrf.mxu3 }
 0x128   :  { %v298_v59 = vadd.f32 %v297_v58, %v285_v57 }
 0x12a   :  { %v301_v60 = vpack.c.bf16 %v298_v59, %v298_v59 }
 0x12c   :  { %v303_v61 = vrot.slane %v301_v60, 3 }
 0x12d   :  { %v286_v62 = vpop.f32.mrf.mxu2 }
 0x12e   :  { %v307_v63 = vsel %vm304_vm1, %v301_v60, %v303_v61  ;;  %v299_v0 = vpop.f32.mrf.mxu3 }
 0x12f   :  { %324 = vst [vmem:[#allocation6] sm:$0x1] %v307_v63 }
 0x136   :  { %v346_v1 = vld [vmem:[#allocation6] sm:$0x1] }
 0x137   :  { %347 = vst [vmem:[%s611_s5] sm:$0x1] %v346_v1 }
 0x138   :  { %365 = vsyncpa [#allocation3], 1 }
 0x139   :  { %366 = vsyncpa [#allocation5], 1 }

</bundles_post_ra>
